<compile_context>
chip_gen: v6e
topology: v6e:2x2x1
jax: 0.10.0
libtpu: 0.0.40
codegen_flags: <defaults>
</compile_context>

<pallas_src>
import jax
import jax.numpy as jnp
from jax.experimental import pallas as pl
from jax.experimental.pallas import tpu as pltpu

EPS = 1e-10
VMEM_LIMIT_BYTES = 32 * 1024 * 1024   # valid on v5e/v6e/v7x
VMEM_BUDGET_BYTES = 24 * 1024 * 1024  # headroom under the scoped limit


def _round_up(x, m):
    return ((x + m - 1) // m) * m


def _vmem_estimate(TB, P, N_all, N_items, G):
    """Rough per-grid-step VMEM footprint (double-buffered blocks + temps)."""
    return (
        2 * TB * P * 4 * 3          # pos_items, pos_scores, neg_scores (dbl-buf)
        + 2 * TB * N_all * 4        # all_scores (dbl-buf)
        + 2 * N_items * G * 2       # genre matrix, bf16 (dbl-buf allocation)
        + 2 * TB * 1 * 4            # output block
        + TB * N_items * 4          # counts temporary
        + TB * N_all * 4            # popularity temporary
        + 3 * TB * G * 4            # genre_counts / probs temporaries
    )


def _pick_tb(B, P, N_all, N_items, G, block_b):
    TB = min(_round_up(block_b, 8), _round_up(B, 8))
    while TB > 8 and _vmem_estimate(TB, P, N_all, N_items, G) > VMEM_BUDGET_BYTES:
        TB = max(8, _round_up(TB // 2, 8))
    return TB


def multi_loss_kernel(w_ref, pos_items_ref, pos_scores_ref, neg_scores_ref,
                      all_scores_ref, genre_ref, out_ref):
    TB, P = pos_scores_ref.shape
    N_items, G = genre_ref.shape
    N_all = all_scores_ref.shape[1]

    wacc = w_ref[0]
    wdiv = w_ref[1]
    wfair = w_ref[2]

    # ---- accuracy loss: -sum(log(eps + sigmoid(pos - neg)), dim=1) ---------
    diff = pos_scores_ref[...] - neg_scores_ref[...]
    sig = 1.0 / (1.0 + jnp.exp(-diff))
    accuracy_loss = -jnp.sum(jnp.log(EPS + sig), axis=1, keepdims=True)     # (TB,1)

    # ---- diversity loss: entropy of per-user genre distribution ------------
    # genre_counts[b] = sum_p genre[pos_items[b, p]] rewritten as a 2-D
    # (TB, N_items) item-count map accumulated over the static P axis
    # (no (B, P, N_items) temporaries), then one bf16 MXU matmul.
    pos = pos_items_ref[...]                                                # (TB,P) i32
    item_iota = jax.lax.broadcasted_iota(jnp.int32, (TB, N_items), 1)       # hoisted
    counts = jnp.zeros((TB, N_items), jnp.float32)
    for p in range(P):                        # P is a compile-time constant
        counts = counts + (pos[:, p:p + 1] == item_iota).astype(jnp.float32)
    # bf16 operands are exact for 0/1 genre entries and small integer counts.
    genre_counts = jnp.dot(counts.astype(jnp.bfloat16), genre_ref[...],
                           preferred_element_type=jnp.float32)              # (TB,G)

    row_sum = jnp.sum(genre_counts, axis=1, keepdims=True)                  # (TB,1)
    safe_sum = jnp.where(row_sum > 0.0, row_sum, 1.0)
    inv_sum = pl.reciprocal(safe_sum, approx=True)                          # EUP slot
    # torch: nan entries (0/0 when a user has zero genre mass) are set to 0
    category_probs = jnp.where(row_sum > 0.0, genre_counts * inv_sum, 0.0)
    probs = jnp.maximum(category_probs, 1e-10)                              # clamp(min=1e-10)
    diversity_loss = -jnp.sum(probs * jnp.log(probs + 1e-10),
                              axis=1, keepdims=True)                        # (TB,1)

    # ---- fairness loss: sum |softplus-popularity - row mean| ----------------
    # Single exp/log pass over the largest tensor (EUP-bound term); matches
    # the (non-stabilized) torch expression log(1 + exp(x) + eps).
    popularity = jnp.log(1.0 + jnp.exp(all_scores_ref[...]) + EPS)          # (TB,N_all)
    mean_pop = jnp.sum(popularity, axis=1, keepdims=True) * (1.0 / N_all)   # (TB,1)
    fairness_loss = jnp.sum(jnp.abs(popularity - mean_pop),
                            axis=1, keepdims=True)                          # (TB,1)

    # TODO(synk): PyTorch's print() debug lines omitted (pl.debug_print could mirror them).
    out_ref[...] = (wacc * accuracy_loss + wdiv * diversity_loss
                    + wfair * fairness_loss)


def multi_loss(wacc, wdiv, wfair, pos_items, neg_items, all_scores,
               pos_scores, neg_scores, item_genre_matrix, *, block_b=128):
    """Pallas TPU forward of Multi_Loss.  Returns total_loss of shape (B,)."""
    # neg_items is unused in the PyTorch forward as well.
    del neg_items
    B, P = pos_scores.shape
    N_all = all_scores.shape[1]
    N_items, G = item_genre_matrix.shape

    # Batch tile: multiple of 8 sublanes, auto-shrunk to fit the VMEM budget.
    TB = _pick_tb(B, P, N_all, N_items, G, block_b)
    B_pad = _round_up(B, TB)

    def pad_b(x):
        if B_pad == B:
            return x
        return jnp.pad(x, ((0, B_pad - B), (0, 0)))   # benign pad rows, sliced off below

    w = jnp.array([wacc, wdiv, wfair], dtype=jnp.float32)
    pos_items_p = pad_b(pos_items.astype(jnp.int32))
    pos_scores_p = pad_b(pos_scores.astype(jnp.float32))
    neg_scores_p = pad_b(neg_scores.astype(jnp.float32))
    all_scores_p = pad_b(all_scores.astype(jnp.float32))
    # bf16 halves VMEM for the resident genre matrix (exact for 0/1 indicators).
    genre_bf16 = item_genre_matrix.astype(jnp.bfloat16)

    grid = (B_pad // TB,)
    out = pl.pallas_call(
        multi_loss_kernel,
        out_shape=jax.ShapeDtypeStruct((B_pad, 1), jnp.float32),
        grid=grid,
        in_specs=[
            pl.BlockSpec(memory_space=pltpu.SMEM),            # weights (3,)
            pl.BlockSpec((TB, P), lambda i: (i, 0)),          # pos_items
            pl.BlockSpec((TB, P), lambda i: (i, 0)),          # pos_scores
            pl.BlockSpec((TB, P), lambda i: (i, 0)),          # neg_scores
            pl.BlockSpec((TB, N_all), lambda i: (i, 0)),      # all_scores
            pl.BlockSpec((N_items, G), lambda i: (0, 0)),     # genre matrix (VMEM-resident)
        ],
        out_specs=pl.BlockSpec((TB, 1), lambda i: (i, 0)),
        compiler_params=pltpu.CompilerParams(
            dimension_semantics=("parallel",),
            vmem_limit_bytes=VMEM_LIMIT_BYTES),
    )(w, pos_items_p, pos_scores_p, neg_scores_p, all_scores_p, genre_bf16)
    return out[:B, 0]


def _reference(wacc, wdiv, wfair, pos_items, all_scores, pos_scores, neg_scores, igm):
    acc = -jnp.sum(jnp.log(EPS + jax.nn.sigmoid(pos_scores - neg_scores)), axis=1)
    gc = igm[pos_items].sum(axis=1)
    rs = gc.sum(axis=1, keepdims=True)
    probs = jnp.where(rs > 0, gc / rs, 0.0)
    probs = jnp.maximum(probs, 1e-10)
    div = -jnp.sum(probs * jnp.log(probs + 1e-10), axis=1)
    pop = jnp.log(1.0 + jnp.exp(all_scores) + EPS)
    fair = jnp.sum(jnp.abs(pop - pop.mean(axis=1, keepdims=True)), axis=1)
    return wacc * acc + wdiv * div + wfair * fair


if __name__ == "__main__":
    key = jax.random.PRNGKey(0)
    B, P, N_ITEMS, G, N_ALL = 8, 8, 128, 16, 128
    k1, k2, k3, k4, k5, k6 = jax.random.split(key, 6)

    pos_items = jax.random.randint(k1, (B, P), 0, N_ITEMS, dtype=jnp.int32)
    neg_items = jax.random.randint(k2, (B, P), 0, N_ITEMS, dtype=jnp.int32)
    pos_scores = jax.random.normal(k3, (B, P), dtype=jnp.float32)
    neg_scores = jax.random.normal(k4, (B, P), dtype=jnp.float32)
    all_scores = jax.random.normal(k5, (B, N_ALL), dtype=jnp.float32)
    item_genre_matrix = (jax.random.uniform(k6, (N_ITEMS, G)) < 0.3).astype(jnp.float32)

    wacc, wdiv, wfair = 1.0, 0.5, 0.25

    total = multi_loss(wacc, wdiv, wfair, pos_items, neg_items, all_scores,
                       pos_scores, neg_scores, item_genre_matrix)
    jax.block_until_ready(total)

    ref = _reference(wacc, wdiv, wfair, pos_items, all_scores,
                     pos_scores, neg_scores, item_genre_matrix)
    assert total.shape == (B,)
    # Tolerance covers the approx EUP reciprocal in the diversity term.
    assert jnp.allclose(total, ref, rtol=1e-3, atol=1e-3), (total, ref)
    print("KERNEL_OK")
</pallas_src>

<mosaic_0001>
module attributes {stable_mosaic.version = 11 : i64} {
  func.func @multi_loss_kernel(%arg0: i32, %arg1: memref<3xf32, #tpu.memory_space<smem>>, %arg2: memref<8x8xi32, #tpu.memory_space<vmem>>, %arg3: memref<8x8xf32, #tpu.memory_space<vmem>>, %arg4: memref<8x8xf32, #tpu.memory_space<vmem>>, %arg5: memref<8x128xf32, #tpu.memory_space<vmem>>, %arg6: memref<128x16xbf16, #tpu.memory_space<vmem>>, %arg7: memref<8x1xf32, #tpu.memory_space<vmem>>) attributes {dimension_semantics = [#tpu.dimension_semantics<parallel>], iteration_bounds = array<i64: 1>, scalar_prefetch = 0 : i64, scratch_operands = 0 : i64, tpu.core_type = #tpu.core_type<tc>, window_params = [{transform_indices = @transform_0, window_bounds = array<i64: 3>}, {transform_indices = @transform_1, window_bounds = array<i64: 8, 8>}, {transform_indices = @transform_2, window_bounds = array<i64: 8, 8>}, {transform_indices = @transform_3, window_bounds = array<i64: 8, 8>}, {transform_indices = @transform_4, window_bounds = array<i64: 8, 128>}, {pipeline_mode = #tpu.pipeline_mode<synchronous>, transform_indices = @transform_5, window_bounds = array<i64: 128, 16>}, {transform_indices = @transform_6, window_bounds = array<i64: 8, 1>}]} {
    %c0 = arith.constant 0 : index
    %0 = memref.load %arg1[%c0] : memref<3xf32, #tpu.memory_space<smem>>
    %c1 = arith.constant 1 : index
    %1 = memref.load %arg1[%c1] : memref<3xf32, #tpu.memory_space<smem>>
    %c2 = arith.constant 2 : index
    %2 = memref.load %arg1[%c2] : memref<3xf32, #tpu.memory_space<smem>>
    %c0_0 = arith.constant 0 : index
    %c0_1 = arith.constant 0 : index
    %3 = vector.load %arg3[%c0_0, %c0_1] : memref<8x8xf32, #tpu.memory_space<vmem>>, vector<8x8xf32>
    %c0_2 = arith.constant 0 : index
    %c0_3 = arith.constant 0 : index
    %4 = vector.load %arg4[%c0_2, %c0_3] : memref<8x8xf32, #tpu.memory_space<vmem>>, vector<8x8xf32>
    %5 = arith.subf %3, %4 : vector<8x8xf32>
    %cst = arith.constant 0.000000e+00 : f32
    %6 = vector.broadcast %cst : f32 to vector<8x8xf32>
    %7 = arith.subf %6, %5 : vector<8x8xf32>
    %8 = math.exp %7 : vector<8x8xf32>
    %cst_4 = arith.constant 1.000000e+00 : f32
    %9 = vector.broadcast %cst_4 : f32 to vector<8x8xf32>
    %10 = arith.addf %9, %8 : vector<8x8xf32>
    %cst_5 = arith.constant 1.000000e+00 : f32
    %11 = vector.broadcast %cst_5 : f32 to vector<8x8xf32>
    %12 = arith.divf %11, %10 : vector<8x8xf32>
    %cst_6 = arith.constant 1.000000e-10 : f32
    %13 = vector.broadcast %cst_6 : f32 to vector<8x8xf32>
    %14 = arith.addf %13, %12 : vector<8x8xf32>
    %15 = math.log %14 : vector<8x8xf32>
    %cst_7 = arith.constant dense<0.000000e+00> : vector<8xf32>
    %16 = vector.multi_reduction <add>, %15, %cst_7 [1] : vector<8x8xf32> to vector<8xf32>
    %17 = vector.shape_cast %16 : vector<8xf32> to vector<8x1xf32>
    %cst_8 = arith.constant 0.000000e+00 : f32
    %18 = vector.broadcast %cst_8 : f32 to vector<8x1xf32>
    %19 = arith.subf %18, %17 : vector<8x1xf32>
    %c0_9 = arith.constant 0 : index
    %c0_10 = arith.constant 0 : index
    %20 = vector.load %arg2[%c0_9, %c0_10] : memref<8x8xi32, #tpu.memory_space<vmem>>, vector<8x8xi32>
    %21 = tpu.iota {dimensions = array<i32: 1>} : vector<8x128xi32>
    %cst_11 = arith.constant 0.000000e+00 : f32
    %22 = vector.broadcast %cst_11 : f32 to vector<8x128xf32>
    %23 = vector.extract_strided_slice %20 {offsets = [0, 0], sizes = [8, 1], strides = [1, 1]} : vector<8x8xi32> to vector<8x1xi32>
    %24 = vector.broadcast %23 : vector<8x1xi32> to vector<8x128xi32>
    %25 = arith.cmpi eq, %24, %21 : vector<8x128xi32>
    %26 = arith.extui %25 : vector<8x128xi1> to vector<8x128xi32>
    %27 = arith.sitofp %26 : vector<8x128xi32> to vector<8x128xf32>
    %28 = arith.addf %22, %27 : vector<8x128xf32>
    %29 = vector.extract_strided_slice %20 {offsets = [0, 1], sizes = [8, 1], strides = [1, 1]} : vector<8x8xi32> to vector<8x1xi32>
    %30 = vector.broadcast %29 : vector<8x1xi32> to vector<8x128xi32>
    %31 = arith.cmpi eq, %30, %21 : vector<8x128xi32>
    %32 = arith.extui %31 : vector<8x128xi1> to vector<8x128xi32>
    %33 = arith.sitofp %32 : vector<8x128xi32> to vector<8x128xf32>
    %34 = arith.addf %28, %33 : vector<8x128xf32>
    %35 = vector.extract_strided_slice %20 {offsets = [0, 2], sizes = [8, 1], strides = [1, 1]} : vector<8x8xi32> to vector<8x1xi32>
    %36 = vector.broadcast %35 : vector<8x1xi32> to vector<8x128xi32>
    %37 = arith.cmpi eq, %36, %21 : vector<8x128xi32>
    %38 = arith.extui %37 : vector<8x128xi1> to vector<8x128xi32>
    %39 = arith.sitofp %38 : vector<8x128xi32> to vector<8x128xf32>
    %40 = arith.addf %34, %39 : vector<8x128xf32>
    %41 = vector.extract_strided_slice %20 {offsets = [0, 3], sizes = [8, 1], strides = [1, 1]} : vector<8x8xi32> to vector<8x1xi32>
    %42 = vector.broadcast %41 : vector<8x1xi32> to vector<8x128xi32>
    %43 = arith.cmpi eq, %42, %21 : vector<8x128xi32>
    %44 = arith.extui %43 : vector<8x128xi1> to vector<8x128xi32>
    %45 = arith.sitofp %44 : vector<8x128xi32> to vector<8x128xf32>
    %46 = arith.addf %40, %45 : vector<8x128xf32>
    %47 = vector.extract_strided_slice %20 {offsets = [0, 4], sizes = [8, 1], strides = [1, 1]} : vector<8x8xi32> to vector<8x1xi32>
    %48 = vector.broadcast %47 : vector<8x1xi32> to vector<8x128xi32>
    %49 = arith.cmpi eq, %48, %21 : vector<8x128xi32>
    %50 = arith.extui %49 : vector<8x128xi1> to vector<8x128xi32>
    %51 = arith.sitofp %50 : vector<8x128xi32> to vector<8x128xf32>
    %52 = arith.addf %46, %51 : vector<8x128xf32>
    %53 = vector.extract_strided_slice %20 {offsets = [0, 5], sizes = [8, 1], strides = [1, 1]} : vector<8x8xi32> to vector<8x1xi32>
    %54 = vector.broadcast %53 : vector<8x1xi32> to vector<8x128xi32>
    %55 = arith.cmpi eq, %54, %21 : vector<8x128xi32>
    %56 = arith.extui %55 : vector<8x128xi1> to vector<8x128xi32>
    %57 = arith.sitofp %56 : vector<8x128xi32> to vector<8x128xf32>
    %58 = arith.addf %52, %57 : vector<8x128xf32>
    %59 = vector.extract_strided_slice %20 {offsets = [0, 6], sizes = [8, 1], strides = [1, 1]} : vector<8x8xi32> to vector<8x1xi32>
    %60 = vector.broadcast %59 : vector<8x1xi32> to vector<8x128xi32>
    %61 = arith.cmpi eq, %60, %21 : vector<8x128xi32>
    %62 = arith.extui %61 : vector<8x128xi1> to vector<8x128xi32>
    %63 = arith.sitofp %62 : vector<8x128xi32> to vector<8x128xf32>
    %64 = arith.addf %58, %63 : vector<8x128xf32>
    %65 = vector.extract_strided_slice %20 {offsets = [0, 7], sizes = [8, 1], strides = [1, 1]} : vector<8x8xi32> to vector<8x1xi32>
    %66 = vector.broadcast %65 : vector<8x1xi32> to vector<8x128xi32>
    %67 = arith.cmpi eq, %66, %21 : vector<8x128xi32>
    %68 = arith.extui %67 : vector<8x128xi1> to vector<8x128xi32>
    %69 = arith.sitofp %68 : vector<8x128xi32> to vector<8x128xf32>
    %70 = arith.addf %64, %69 : vector<8x128xf32>
    %71 = arith.truncf %70 : vector<8x128xf32> to vector<8x128xbf16>
    %c0_12 = arith.constant 0 : index
    %c0_13 = arith.constant 0 : index
    %72 = vector.load %arg6[%c0_12, %c0_13] : memref<128x16xbf16, #tpu.memory_space<vmem>>, vector<128x16xbf16>
    %cst_14 = arith.constant dense<0.000000e+00> : vector<8x16xf32>
    %73 = tpu.matmul %71, %72, %cst_14 {dimension_numbers = #tpu.dot_dimension_numbers<[1], [0], [0], [1], [0, 0, 1, 1], [], []>} : vector<8x128xbf16>, vector<128x16xbf16>, vector<8x16xf32> -> vector<8x16xf32>
    %cst_15 = arith.constant dense<0.000000e+00> : vector<8xf32>
    %74 = vector.multi_reduction <add>, %73, %cst_15 [1] : vector<8x16xf32> to vector<8xf32>
    %75 = vector.shape_cast %74 : vector<8xf32> to vector<8x1xf32>
    %cst_16 = arith.constant 0.000000e+00 : f32
    %76 = vector.broadcast %cst_16 : f32 to vector<8x1xf32>
    %77 = arith.cmpf ogt, %75, %76 : vector<8x1xf32>
    %cst_17 = arith.constant 1.000000e+00 : f32
    %78 = vector.broadcast %cst_17 : f32 to vector<8x1xf32>
    %79 = arith.select %77, %75, %78 : vector<8x1xi1>, vector<8x1xf32>
    %80 = tpu.reciprocal %79 {approx = true} : vector<8x1xf32> -> vector<8x1xf32>
    %cst_18 = arith.constant 0.000000e+00 : f32
    %81 = vector.broadcast %cst_18 : f32 to vector<8x1xf32>
    %82 = arith.cmpf ogt, %75, %81 : vector<8x1xf32>
    %83 = vector.broadcast %80 : vector<8x1xf32> to vector<8x16xf32>
    %84 = arith.mulf %73, %83 : vector<8x16xf32>
    %cst_19 = arith.constant 0.000000e+00 : f32
    %85 = vector.shape_cast %82 : vector<8x1xi1> to vector<8x1xi1>
    %86 = vector.broadcast %85 : vector<8x1xi1> to vector<8x16xi1>
    %87 = vector.broadcast %cst_19 : f32 to vector<8x16xf32>
    %88 = arith.select %86, %84, %87 : vector<8x16xi1>, vector<8x16xf32>
    %cst_20 = arith.constant 1.000000e-10 : f32
    %89 = vector.broadcast %cst_20 : f32 to vector<8x16xf32>
    %90 = arith.maximumf %88, %89 : vector<8x16xf32>
    %cst_21 = arith.constant 1.000000e-10 : f32
    %91 = vector.broadcast %cst_21 : f32 to vector<8x16xf32>
    %92 = arith.addf %90, %91 : vector<8x16xf32>
    %93 = math.log %92 : vector<8x16xf32>
    %94 = arith.mulf %90, %93 : vector<8x16xf32>
    %cst_22 = arith.constant dense<0.000000e+00> : vector<8xf32>
    %95 = vector.multi_reduction <add>, %94, %cst_22 [1] : vector<8x16xf32> to vector<8xf32>
    %96 = vector.shape_cast %95 : vector<8xf32> to vector<8x1xf32>
    %cst_23 = arith.constant 0.000000e+00 : f32
    %97 = vector.broadcast %cst_23 : f32 to vector<8x1xf32>
    %98 = arith.subf %97, %96 : vector<8x1xf32>
    %c0_24 = arith.constant 0 : index
    %c0_25 = arith.constant 0 : index
    %99 = vector.load %arg5[%c0_24, %c0_25] : memref<8x128xf32, #tpu.memory_space<vmem>>, vector<8x128xf32>
    %100 = math.exp %99 : vector<8x128xf32>
    %cst_26 = arith.constant 1.000000e+00 : f32
    %101 = vector.broadcast %cst_26 : f32 to vector<8x128xf32>
    %102 = arith.addf %101, %100 : vector<8x128xf32>
    %cst_27 = arith.constant 1.000000e-10 : f32
    %103 = vector.broadcast %cst_27 : f32 to vector<8x128xf32>
    %104 = arith.addf %102, %103 : vector<8x128xf32>
    %105 = math.log %104 : vector<8x128xf32>
    %cst_28 = arith.constant dense<0.000000e+00> : vector<8xf32>
    %106 = vector.multi_reduction <add>, %105, %cst_28 [1] : vector<8x128xf32> to vector<8xf32>
    %107 = vector.shape_cast %106 : vector<8xf32> to vector<8x1xf32>
    %cst_29 = arith.constant 7.812500e-03 : f32
    %108 = vector.broadcast %cst_29 : f32 to vector<8x1xf32>
    %109 = arith.mulf %107, %108 : vector<8x1xf32>
    %110 = vector.broadcast %109 : vector<8x1xf32> to vector<8x128xf32>
    %111 = arith.subf %105, %110 : vector<8x128xf32>
    %112 = math.absf %111 : vector<8x128xf32>
    %cst_30 = arith.constant dense<0.000000e+00> : vector<8xf32>
    %113 = vector.multi_reduction <add>, %112, %cst_30 [1] : vector<8x128xf32> to vector<8xf32>
    %114 = vector.shape_cast %113 : vector<8xf32> to vector<8x1xf32>
    %115 = vector.broadcast %0 : f32 to vector<8x1xf32>
    %116 = arith.mulf %115, %19 : vector<8x1xf32>
    %117 = vector.broadcast %1 : f32 to vector<8x1xf32>
    %118 = arith.mulf %117, %98 : vector<8x1xf32>
    %119 = arith.addf %116, %118 : vector<8x1xf32>
    %120 = vector.broadcast %2 : f32 to vector<8x1xf32>
    %121 = arith.mulf %120, %114 : vector<8x1xf32>
    %122 = arith.addf %119, %121 : vector<8x1xf32>
    %c0_31 = arith.constant 0 : index
    %c0_32 = arith.constant 0 : index
    %123 = vector.load %arg7[%c0_31, %c0_32] : memref<8x1xf32, #tpu.memory_space<vmem>>, vector<8x1xf32>
    tpu.vector_store %arg7[%c0_31, %c0_32], %122 {strides = array<i32>} : memref<8x1xf32, #tpu.memory_space<vmem>>, vector<8x1xf32>,
    return
  }
  func.func @transform_0(%arg0: i32) -> i32 {
    %c0_i32 = arith.constant 0 : i32
    %c0_i32_0 = arith.constant 0 : i32
    return %c0_i32 : i32
  }
  func.func @transform_1(%arg0: i32) -> (i32, i32) {
    %c0_i32 = arith.constant 0 : i32
    %c0_i32_0 = arith.constant 0 : i32
    return %arg0, %c0_i32 : i32, i32
  }
  func.func @transform_2(%arg0: i32) -> (i32, i32) {
    %c0_i32 = arith.constant 0 : i32
    %c0_i32_0 = arith.constant 0 : i32
    return %arg0, %c0_i32 : i32, i32
  }
  func.func @transform_3(%arg0: i32) -> (i32, i32) {
    %c0_i32 = arith.constant 0 : i32
    %c0_i32_0 = arith.constant 0 : i32
    return %arg0, %c0_i32 : i32, i32
  }
  func.func @transform_4(%arg0: i32) -> (i32, i32) {
    %c0_i32 = arith.constant 0 : i32
    %c0_i32_0 = arith.constant 0 : i32
    return %arg0, %c0_i32 : i32, i32
  }
  func.func @transform_5(%arg0: i32) -> (i32, i32) {
    %c0_i32 = arith.constant 0 : i32
    %c0_i32_0 = arith.constant 0 : i32
    %c0_i32_1 = arith.constant 0 : i32
    return %c0_i32, %c0_i32_0 : i32, i32
  }
  func.func @transform_6(%arg0: i32) -> (i32, i32) {
    %c0_i32 = arith.constant 0 : i32
    %c0_i32_0 = arith.constant 0 : i32
    return %arg0, %c0_i32 : i32, i32
  }
}

</mosaic_0001>

<bundles_post_ra>
// kernel: tpu_custom_call.1
= control target key start
LH: loop header
LB: loop body
LE: loop exit
PB: predicated region body
PF: predicated region fallthrough
CT: control target
= control target key end

     0   :  { %11 = vsyncpa [#allocation3], 0  ;;  %s480_s0 = inlined_call_operand.vmem [shape: f32[3], index: 0, kind: input, shape index: {}]   ;;  %s481_s1 = inlined_call_operand.vmem [shape: s32[8,8], index: 1, kind: input, shape index: {}]   ;;  %s482_s2 = inlined_call_operand.vmem [shape: f32[8,8], index: 2, kind: input, shape index: {}]   ;;  %s483_s3 = inlined_call_operand.vmem [shape: f32[8,8], index: 3, kind: input, shape index: {}]   ;;  %s484_s4 = inlined_call_operand.vmem [shape: f32[8,128], index: 4, kind: input, shape index: {}]   ;;  %s485_s5 = inlined_call_operand.vmem [shape: bf16[128,16], index: 5, kind: input, shape index: {}]   ;;  %s486_s6 = inlined_call_operand.vmem [shape: f32[8,1], index: 6, kind: output, shape index: {}]  }
   0x1   :  { %s18_s23 = sshll.u32 %s480_s0, 4  ;;  %s19_s23 = int_to_ptr.vmem [resolvable:$true] %s18_s23 }
   0x2   :  { %s359_s24 = scalar_lea.vmem %s19_s23, 16  ;;  %p364_p1 = scmp.lt.s32.totalorder %s19_s23, %s19_s23 }
   0x3   :  { %p360_p0 = scmp.ne.s32.totalorder %s19_s23, %s359_s24  ;;  %p365_p2 = scmp.lt.s32.totalorder %s359_s24, %s359_s24 }
   0x5   :  { %p366_p3 = por %p365_p2, %p364_p1 }
   0x7   :  { %p367_p4 = pnand %p366_p3, %p360_p0 }
   0x9   :  { %370 = shalt.err (!%p367_p4)
}
   0xa   :  { %s373_s25 = smov [#allocation2]  }
   0xb   :  { %21 = dma.vmem_to_smem %s19_s23, 16, %s373_s25, [#allocation3]  }
   0xc   :  { %371 = dma.done.wait [#allocation3], 16  }
   0xd   :  { %372 = vsyncadd [#allocation3], 4294967280 }
   0xe   :  { %35 = sfence }
   0xf   :  { %v57_v0 = vld [vmem:[%s481_s1] sm:$0xff]  ;;  %v337_v1 = vld [vmem:[%s485_s5 + $0x38] sm:$0xff]   ;;  %v374_v2 = vmov 2   ;;  %v375_v3 = vmov 0   ;;  %v376_v4 = vmov 0.0   ;;  %v338_v5 = vld [vmem:[%s485_s5 + $0x30] sm:$0xff]   ;;  %v58_v18 = vlaneseq }
  0x10   :  { %330 = vset.pattern.permute.xlu1 %v374_v2  ;;  %328 = vset.pattern.permute.xlu0 %v375_v3  ;;  %v377_v6 = vmov 3   ;;  %v378_v7 = vmov 1   ;;  %v339_v8 = vld [vmem:[%s485_s5 + $0x28] sm:$0xff]   ;;  %v379_v9 = vmov 4   ;;  %v380_v10 = vmov 5   ;;  %v340_v11 = vld [vmem:[%s485_s5 + $0x20] sm:$0xff]  }
  0x11   :  { %75 = vperm.xlu1 %330, %v57_v0   ;;  %61 = vperm.xlu0 %328, %v57_v0   ;;  %v381_v12 = vmov 6   ;;  %v382_v13 = vmov 7   ;;  %v341_v14 = vld [vmem:[%s485_s5 + $0x18] sm:$0xff]   ;;  %v342_v15 = vld [vmem:[%s485_s5 + $0x10] sm:$0xff]   ;;  %vm383_vm0 = vmmov 0   ;;  %v343_v16 = vld [vmem:[%s485_s5 + $0x8] sm:$0xff]  }
  0x12   :  { %297 = vmatprep.subr.bf16.mxu0 %v376_v4  ;;  %313 = vmatprep.mubr.msk.bf16.mxu0 %vm383_vm0, %v376_v4  ;;  %v344_v17 = vld [vmem:[%s485_s5] sm:$0xff]   ;;  %v59_v21 = vand.u32 127, %v58_v18  ;;  %vm221_vm9 = vcmask 130048   ;;  %vm52_vm10 = vcmask 64512   ;;  %vm263_vm12 = vcmask 7168  }
  0x13   :  { %298 = vmatpush3.bf16.msra.mxu0 %v337_v1  ;;  %v241_v44 = vld [vmem:[%s484_s4] sm:$0xff]  ;;  %s271_s4 = sld [smem:[#allocation2 + $0x2]] }
  0x14   :  { %299 = vmatprep.subr.bf16.mxu0 %v376_v4  ;;  %v242_v45 = vmul.f32 1.442695, %v241_v44  ;;  %v40_v51 = vld [vmem:[%s482_s2] sm:$0xff]  ;;  %s37_s2 = sld [smem:[#allocation2]] }
  0x15   :  { %331 = vset.pattern.permute.xlu1 %v377_v6  ;;  %329 = vset.pattern.permute.xlu0 %v378_v7  ;;  %v41_v52 = vld [vmem:[%s483_s3] sm:$0xff]  ;;  %s270_s3 = sld [smem:[#allocation2 + $0x1]] }
  0x16   :  { %82 = vperm.xlu1 %331, %v57_v0   ;;  %68 = vperm.xlu0 %329, %v57_v0   ;;  %345 = vpow2.f32 %v242_v45  ;;  %v42_v53 = vsub.f32 %v40_v51, %v41_v52 }
  0x17   :  { %300 = vmatpush3.bf16.msra.mxu0 %v338_v5 }
  0x18   :  { %301 = vmatprep.subr.bf16.mxu0 %v376_v4  ;;  %v43_v54 = vsub.f32 0.0, %v42_v53 }
  0x1a   :  { %332 = vset.pattern.permute.xlu1 %v379_v9  ;;  %333 = vset.pattern.permute.xlu0 %v380_v10  ;;  %v44_v55 = vmul.f32 1.442695, %v43_v54 }
  0x1b   :  { %89 = vperm.xlu1 %332, %v57_v0   ;;  %96 = vperm.xlu0 %333, %v57_v0  }
  0x1c   :  { %302 = vmatpush3.bf16.msra.mxu0 %v339_v8 }
  0x1d   :  { %303 = vmatprep.subr.bf16.mxu0 %v376_v4 }
  0x1f   :  { %334 = vset.pattern.permute.xlu1 %v381_v12  ;;  %336 = vset.pattern.permute.xlu0 %v382_v13 }
  0x20   :  { %103 = vperm.xlu1 %334, %v57_v0   ;;  %304 = vmatpush3.bf16.msra.mxu0 %v340_v11 }
  0x21   :  { %305 = vmatprep.subr.bf16.mxu0 %v376_v4 }
  0x23   :  { %v346_v46 = vpop.eup %345 }
  0x24   :  { %335 = vset.pattern.permute.xlu1 %v382_v13  ;;  %306 = vmatpush3.bf16.msra.mxu0 %v341_v14  ;;  %v244_v47 = vadd.f32 1.0, %v346_v46 }
  0x25   :  { %110 = vperm.xlu1 %335, %v57_v0   ;;  %307 = vmatprep.subr.bf16.mxu0 %v376_v4 }
  0x26   :  { %v245_v48 = vadd.f32 1e-10, %v244_v47 }
  0x28   :  { %308 = vmatpush3.bf16.msra.mxu0 %v342_v15  ;;  %347 = vlog2.f32 %v245_v48 }
  0x29   :  { %309 = vmatprep.subr.bf16.mxu0 %v376_v4  ;;  %349 = vpow2.f32 %v44_v55 }
  0x2c   :  { %310 = vmatpush3.bf16.msra.mxu0 %v343_v16 }
  0x2d   :  { %311 = vmatprep.subr.bf16.mxu0 %v376_v4 }
  0x30   :  { %312 = vmatpush3.bf16.msra.mxu0 %v344_v17 }
  0x35   :  { %v348_v49 = vpop.eup %347 }
  0x36   :  { %v247_v50 = vmul.f32 0.6931472, %v348_v49  ;;  %v350_v61 = vpop.eup %349 }
  0x37   :  { %v46_v62 = vadd.f32 1.0, %v350_v61 }
  0x39   :  { %351 = vrcp.f32 %v46_v62 }
  0x46   :  { %v352_v63 = vpop.eup %351 }
  0x47   :  { %v49_v0 = vadd.f32 1e-10, %v352_v63 }
  0x49   :  { %248 = vadd.xlane.f32.xlu1 %v247_v50  ;;  %353 = vlog2.f32 %v49_v0 }
  0x56   :  { %v354_v1 = vpop.eup %353 }
  0x57   :  { %v51_v2 = vmul.f32 0.6931472, %v354_v1 }
  0x59   :  { %v53_v3 = vsel %vm52_vm10, %v51_v2, 0.0 }
  0x8c   :  { %v76_v19 = vpop.permute.xlu1 %75  ;;  %v62_v20 = vpop.permute.xlu0 %61 }
  0x8d   :  { %vm63_vm1 = vcmp.eq.s32.totalorder %v62_v20, %v59_v21  ;;  %vm77_vm2 = vcmp.eq.s32.totalorder %v76_v19, %v59_v21 }
  0x8e   :  { %v272_v24 = vsel %vm63_vm1, 1.0, %v376_v4  ;;  %v274_v27 = vsel %vm77_vm2, 1.0, %v376_v4 }
  0x91   :  { %v83_v22 = vpop.permute.xlu1 %82  ;;  %v69_v23 = vpop.permute.xlu0 %68 }
  0x92   :  { %vm70_vm3 = vcmp.eq.s32.totalorder %v69_v23, %v59_v21  ;;  %vm84_vm4 = vcmp.eq.s32.totalorder %v83_v22, %v59_v21  ;;  %v257_v23 = vstv %s270_s3 }
  0x93   :  { %v273_v25 = vsel %vm70_vm3, 1.0, %v376_v4  ;;  %v275_v31 = vsel %vm84_vm4, 1.0, %v376_v4 }
  0x94   :  { %v73_v26 = vadd.f32 %v273_v25, %v272_v24  ;;  %v260_v25 = vstv %s271_s4 }
  0x96   :  { %v80_v28 = vadd.f32 %v274_v27, %v73_v26  ;;  %v90_v29 = vpop.permute.xlu1 %89  ;;  %v97_v30 = vpop.permute.xlu0 %96 }
  0x97   :  { %vm91_vm5 = vcmp.eq.s32.totalorder %v90_v29, %v59_v21  ;;  %vm98_vm6 = vcmp.eq.s32.totalorder %v97_v30, %v59_v21 }
  0x98   :  { %v87_v32 = vadd.f32 %v275_v31, %v80_v28  ;;  %v276_v33 = vsel %vm91_vm5, 1.0, %v376_v4  ;;  %v277_v35 = vsel %vm98_vm6, 1.0, %v376_v4 }
  0x9a   :  { %v94_v34 = vadd.f32 %v276_v33, %v87_v32 }
  0x9b   :  { %v104_v36 = vpop.permute.xlu1 %103 }
  0x9c   :  { %vm105_vm7 = vcmp.eq.s32.totalorder %v104_v36, %v59_v21  ;;  %v101_v37 = vadd.f32 %v277_v35, %v94_v34 }
  0x9d   :  { %v278_v38 = vsel %vm105_vm7, 1.0, %v376_v4 }
  0x9e   :  { %v108_v40 = vadd.f32 %v278_v38, %v101_v37 }
  0xa0   :  { %v111_v39 = vpop.permute.xlu1 %110 }
  0xa1   :  { %vm112_vm8 = vcmp.eq.s32.totalorder %v111_v39, %v59_v21  ;;  %v255_v21 = vstv %s37_s2 }
  0xa2   :  { %v279_v41 = vsel %vm112_vm8, 1.0, %v376_v4 }
  0xa3   :  { %v115_v42 = vadd.f32 %v279_v41, %v108_v40 }
  0xa5   :  { %v116_v43 = vpack.c.bf16 %v115_v42, %v115_v42 }
  0xa7   :  { %314 = vmatmul.mubr.bf16.vlgmr.msra.gmra.mxu0 %v116_v43 }
  0xd2   :  { %v249_v4 = vpop.xlane.xlu1 %248 }
  0xd3   :  { %v250_v5 = vmul.f32 0.0078125, %v249_v4 }
  0xd5   :  { %v251_v6 = vsub.f32 %v247_v50, %v250_v5 }
  0xd7   :  { %v252_v7 = vand.u32 2147483647, %v251_v6 }
  0xd9   :  { %253 = vadd.xlane.f32.xlu1 %v252_v7 }
 0x162   :  { %v254_v24 = vpop.xlane.xlu1 %253 }
 0x163   :  { %v261_v29 = vmul.f32 %v260_v25, %v254_v24 }
 0x167   :  { %v215_v56 = vpop.f32.mrf.mxu0 }
 0x168   :  { %v222_v57 = vsel %vm221_vm9, %v215_v56, 0.0 }
 0x169   :  { %223 = vadd.xlane.f32.xlu0 %v222_v57  ;;  %v315_v58 = vpop.f32.mrf.mxu0 }
 0x16b   :  { %v218_v59 = vpop.f32.mrf.mxu0 }
 0x16d   :  { %v316_v60 = vpop.f32.mrf.mxu0  ;;  %54 = vadd.xlane.f32.xlu0 %v53_v3 }
 0x1f2   :  { %v224_v8 = vpop.xlane.xlu0 %223 }
 0x1f3   :  { %vm225_vm11 = vcmp.gt.f32.partialorder %v224_v8, 0.0 }
 0x1f4   :  { %v226_v9 = vsel %vm225_vm11, %v224_v8, 1.0 }
 0x1f5   :  { %355 = vrcp.f32 %v226_v9 }
 0x1f6   :  { %v55_v19 = vpop.xlane.xlu0 %54 }
 0x1f7   :  { %v56_v20 = vsub.f32 0.0, %v55_v19 }
 0x1f9   :  { %v256_v27 = vmul.f32 %v255_v21, %v56_v20 }
 0x202   :  { %v356_v10 = vpop.eup %355 }
 0x203   :  { %v228_v11 = vmul.f32 %v356_v10, %v215_v56 }
 0x205   :  { %v231_v12 = vsel %vm225_vm11, %v228_v11, 0.0 }
 0x206   :  { %v232_v13 = vmax.f32 %v231_v12, 1e-10 }
 0x208   :  { %v233_v14 = vadd.f32 1e-10, %v232_v13 }
 0x20a   :  { %357 = vlog2.f32 %v233_v14 }
 0x217   :  { %v358_v15 = vpop.eup %357 }
 0x218   :  { %v235_v16 = vmul.f32 0.6931472, %v358_v15 }
 0x21a   :  { %v236_v17 = vmul.f32 %v235_v16, %v232_v13 }
 0x21c   :  { %v237_v18 = vsel %vm221_vm9, %v236_v17, 0.0 }
 0x21d   :  { %238 = vadd.xlane.f32.xlu0 %v237_v18 }
 0x2a6   :  { %v239_v22 = vpop.xlane.xlu0 %238 }
 0x2a7   :  { %v240_v26 = vsub.f32 0.0, %v239_v22 }
 0x2a9   :  { %v258_v28 = vmul.f32 %v257_v23, %v240_v26 }
 0x2ab   :  { %v259_v30 = vadd.f32 %v258_v28, %v256_v27 }
 0x2ad   :  { %v262_v31 = vadd.f32 %v261_v29, %v259_v30 }
 0x2af   :  { %264 = vst.msk [vmem:[%s486_s6] sm:$0xff] %vm263_vm12, %v262_v31 }
 0x2b0   :  { %269 = vsyncpa [#allocation3], 1 }

</bundles_post_ra>
